<compile_context>
chip_gen: v5e
topology: v5e:2x2
jax: 0.10.0
libtpu: 0.0.40
codegen_flags: <defaults>
</compile_context>

<pallas_src>
import functools
import math

import jax
import jax.numpy as jnp
from jax.experimental import pallas as pl
from jax.experimental.pallas import tpu as pltpu

_SUBLANE = {4: 8, 2: 16, 1: 32}  # sublane packing multiple by itemsize


def _vmem_limit_bytes():
    """Generation-aware scoped VMEM limit: 64 MiB on 128 MiB parts, 48 MiB on v7x."""
    cap = 64 * 1024 * 1024  # conservative fallback (v7x per-TC VMEM)
    try:
        info = pltpu.get_tpu_info()
        cap = int(getattr(info, "vmem_capacity_bytes", cap))
    except Exception:
        pass
    return min(64 * 1024 * 1024, (cap * 3) // 4)


def _pick_block_rows(rows, dim, dtype, target_f32_bytes):
    """Pick a large, dtype-aligned row tile whose f32 working set is ~target bytes."""
    itemsize = jnp.dtype(dtype).itemsize
    sub = _SUBLANE.get(itemsize, 8)
    row_f32_bytes = max(1, dim * 4)  # size by the f32 working set (covers casts/temps)
    br = (target_f32_bytes // row_f32_bytes) // sub * sub
    br = max(sub, min(br, 8192))
    if rows >= 2 * sub:
        # Guarantee >=2 grid steps so both v7x TensorCores get work
        # (negligible cost on single-TC v5e/v6e: at most one extra grid step).
        br = min(br, max(sub, (rows // (2 * sub)) * sub))
    elif rows >= sub:
        br = min(br, (rows // sub) * sub)
    else:
        # Full-extent second-to-last dim is always a legal block shape.
        br = rows
    return br


# --------------------------------------------------------------------------
# Main path: one tile spans the full feature dim.
# --------------------------------------------------------------------------
def _rms_norm_kernel(x_ref, o_ref, *, scale, eps):
    xf = x_ref[...].astype(jnp.float32)
    sq_sum = jnp.sum(xf * xf, axis=-1, keepdims=True)
    # max(sqrt(s), eps) == sqrt(max(s, eps^2)); 1e-24 is a normal f32.
    inv = scale * jax.lax.rsqrt(jnp.maximum(sq_sum, eps * eps))
    # Multiply in f32, cast once at the store: free under the DMA bound, and
    # keeps full precision for bf16 / makes int8 & fp8 inputs behave correctly.
    o_ref[...] = (xf * inv).astype(o_ref.dtype)


# --------------------------------------------------------------------------
# Wide-row fallback: dim is chunked; two passes (sq-sum accumulate, then scale).
# --------------------------------------------------------------------------
def _sqsum_kernel(x_ref, ss_ref, *, dim, dim_block, mask_cols):
    @pl.when(pl.program_id(1) == 0)
    def _():
        ss_ref[...] = jnp.zeros_like(ss_ref)

    xf = x_ref[...].astype(jnp.float32)
    if mask_cols:
        col = (jax.lax.broadcasted_iota(jnp.int32, xf.shape, 1)
               + pl.program_id(1) * dim_block)
        xf = jnp.where(col < dim, xf, 0.0)
    ss_ref[...] += jnp.sum(xf * xf, axis=-1, keepdims=True)


def _scale_kernel(x_ref, ss_ref, o_ref, *, scale, eps):
    xf = x_ref[...].astype(jnp.float32)
    inv = scale * jax.lax.rsqrt(jnp.maximum(ss_ref[...], eps * eps))
    o_ref[...] = (xf * inv).astype(o_ref.dtype)


def simple_rms_norm(x, *, block_rows=None, dim_block=None, eps=1e-12):
    """SimpleRMSNorm forward: L2-normalize along last dim, multiply by dim**-0.5."""
    orig_shape = x.shape
    dim = orig_shape[-1]
    scale = float(dim) ** (-0.5)

    rows = math.prod(orig_shape[:-1]) if len(orig_shape) > 1 else 1
    x2d = x.reshape(rows, dim)

    vmem_limit = _vmem_limit_bytes()
    target_f32 = min(8 * 1024 * 1024, vmem_limit // 8)
    itemsize = jnp.dtype(x.dtype).itemsize
    sub = _SUBLANE.get(itemsize, 8)

    # Fall back to dim-chunking only if even a minimal (sub, dim) tile would
    # exceed the per-tile working-set target (or the caller forces it).
    use_dim_chunk = dim_block is not None or (sub * dim * 4 > target_f32)

    if not use_dim_chunk:
        if block_rows is None:
            block_rows = _pick_block_rows(rows, dim, x.dtype, target_f32)
        # No jnp.pad: let the grid over-run; Pallas drops OOB stores of the
        # partial last row block (rows are independent).
        grid = (pl.cdiv(rows, block_rows),)
        # NOTE: if `dim` is not a multiple of 128 the kernel is correct but the
        # stores become lane-masked; pad the feature dim to 128 upstream if a
        # small head_dim ever dominates the store path.
        out2d = pl.pallas_call(
            functools.partial(_rms_norm_kernel, scale=scale, eps=eps),
            out_shape=jax.ShapeDtypeStruct((rows, dim), x.dtype),
            grid_spec=pltpu.PrefetchScalarGridSpec(
                num_scalar_prefetch=0,
                grid=grid,
                in_specs=[pl.BlockSpec((block_rows, dim), lambda i: (i, 0))],
                out_specs=pl.BlockSpec((block_rows, dim), lambda i: (i, 0)),
            ),
            compiler_params=pltpu.CompilerParams(
                dimension_semantics=("parallel",),
                vmem_limit_bytes=vmem_limit,
            ),
        )(x2d)
        return out2d.reshape(orig_shape)

    # ---------------- dim-chunked two-pass path ----------------
    dim_padded_128 = ((dim + 127) // 128) * 128
    if dim_block is None:
        dim_block = max(128, min(((target_f32 // (sub * 4)) // 128) * 128,
                                 dim_padded_128))
    dim_block = max(128, min((dim_block // 128) * 128, dim_padded_128))
    if block_rows is None:
        block_rows = _pick_block_rows(rows, dim_block, x.dtype, target_f32)

    nr = pl.cdiv(rows, block_rows)
    nd = pl.cdiv(dim, dim_block)
    mask_cols = (dim % dim_block) != 0

    # Pass 1: per-row squared L2 norm, accumulated across dim chunks.
    ss = pl.pallas_call(
        functools.partial(_sqsum_kernel, dim=dim, dim_block=dim_block,
                          mask_cols=mask_cols),
        out_shape=jax.ShapeDtypeStruct((rows, 1), jnp.float32),
        grid_spec=pltpu.PrefetchScalarGridSpec(
            num_scalar_prefetch=0,
            grid=(nr, nd),
            in_specs=[pl.BlockSpec((block_rows, dim_block), lambda i, j: (i, j))],
            out_specs=pl.BlockSpec((block_rows, 1), lambda i, j: (i, 0)),
        ),
        compiler_params=pltpu.CompilerParams(
            dimension_semantics=("parallel", "arbitrary"),
            vmem_limit_bytes=vmem_limit,
        ),
    )(x2d)

    # Pass 2: scale each chunk by dim**-0.5 / max(||x||, eps).
    out2d = pl.pallas_call(
        functools.partial(_scale_kernel, scale=scale, eps=eps),
        out_shape=jax.ShapeDtypeStruct((rows, dim), x.dtype),
        grid_spec=pltpu.PrefetchScalarGridSpec(
            num_scalar_prefetch=0,
            grid=(nr, nd),
            in_specs=[pl.BlockSpec((block_rows, dim_block), lambda i, j: (i, j)),
                      pl.BlockSpec((block_rows, 1), lambda i, j: (i, 0))],
            out_specs=pl.BlockSpec((block_rows, dim_block), lambda i, j: (i, j)),
        ),
        compiler_params=pltpu.CompilerParams(
            dimension_semantics=("parallel", "parallel"),
            vmem_limit_bytes=vmem_limit,
        ),
    )(x2d, ss)

    return out2d.reshape(orig_shape)


def _reference(x, eps=1e-12):
    dim = x.shape[-1]
    norm = jnp.sqrt(jnp.sum(x.astype(jnp.float32) ** 2, axis=-1, keepdims=True))
    return (x.astype(jnp.float32) / jnp.maximum(norm, eps) * (dim ** -0.5)).astype(x.dtype)


if __name__ == "__main__":
    key = jax.random.PRNGKey(0)
    k1, k2, k3, k4 = jax.random.split(key, 4)

    # Shape consistent with the module's docstring usage (B, S, D), normalize over D.
    B, S, D = 2, 8, 512
    x = jax.random.normal(k1, (B, S, D), dtype=jnp.float32)
    y = jax.block_until_ready(simple_rms_norm(x))
    assert y.shape == x.shape
    assert jnp.allclose(y, _reference(x), atol=1e-5, rtol=1e-5)

    # Row count not divisible by the sublane multiple -> partial-last-block path.
    x2 = jax.random.normal(k2, (1, 10, 512), dtype=jnp.float32)
    y2 = jax.block_until_ready(simple_rms_norm(x2))
    assert y2.shape == x2.shape
    assert jnp.allclose(y2, _reference(x2), atol=1e-5, rtol=1e-5)

    # bf16 input: the f32 multiply keeps full precision up to the final cast.
    x3 = jax.random.normal(k3, (2, 8, 512), dtype=jnp.bfloat16)
    y3 = jax.block_until_ready(simple_rms_norm(x3))
    assert jnp.allclose(y3.astype(jnp.float32),
                        _reference(x3).astype(jnp.float32),
                        atol=5e-4, rtol=2e-2)

    # Force the dim-chunked two-pass fallback (wide-row / v7x VMEM-safety path).
    x4 = jax.random.normal(k4, (2, 16, 512), dtype=jnp.float32)
    y4 = jax.block_until_ready(simple_rms_norm(x4, dim_block=128))
    assert y4.shape == x4.shape
    assert jnp.allclose(y4, _reference(x4), atol=1e-5, rtol=1e-5)

    print("KERNEL_OK")
</pallas_src>

<mosaic_0001>
module attributes {stable_mosaic.version = 11 : i64} {
  func.func @_rms_norm_kernel(%arg0: i32, %arg1: memref<8x512xf32, #tpu.memory_space<vmem>>, %arg2: memref<8x512xf32, #tpu.memory_space<vmem>>) attributes {dimension_semantics = [#tpu.dimension_semantics<parallel>], iteration_bounds = array<i64: 2>, scalar_prefetch = 0 : i64, scratch_operands = 0 : i64, tpu.core_type = #tpu.core_type<tc>, window_params = [{transform_indices = @transform_0, window_bounds = array<i64: 8, 512>}, {transform_indices = @transform_1, window_bounds = array<i64: 8, 512>}]} {
    %c0 = arith.constant 0 : index
    %c0_0 = arith.constant 0 : index
    %0 = vector.load %arg1[%c0, %c0_0] : memref<8x512xf32, #tpu.memory_space<vmem>>, vector<8x512xf32>
    %1 = arith.mulf %0, %0 : vector<8x512xf32>
    %cst = arith.constant dense<0.000000e+00> : vector<8xf32>
    %2 = vector.multi_reduction <add>, %1, %cst [1] : vector<8x512xf32> to vector<8xf32>
    %3 = vector.shape_cast %2 : vector<8xf32> to vector<8x1xf32>
    %cst_1 = arith.constant 1.000000e-24 : f32
    %4 = vector.broadcast %cst_1 : f32 to vector<8x1xf32>
    %5 = arith.maximumf %3, %4 : vector<8x1xf32>
    %6 = math.rsqrt %5 : vector<8x1xf32>
    %cst_2 = arith.constant 0.0441941731 : f32
    %7 = vector.broadcast %cst_2 : f32 to vector<8x1xf32>
    %8 = arith.mulf %7, %6 : vector<8x1xf32>
    %9 = vector.broadcast %8 : vector<8x1xf32> to vector<8x512xf32>
    %10 = arith.mulf %0, %9 : vector<8x512xf32>
    %c0_3 = arith.constant 0 : index
    %c0_4 = arith.constant 0 : index
    %11 = vector.load %arg2[%c0_3, %c0_4] : memref<8x512xf32, #tpu.memory_space<vmem>>, vector<8x512xf32>
    tpu.vector_store %arg2[%c0_3, %c0_4], %10 {strides = array<i32>} : memref<8x512xf32, #tpu.memory_space<vmem>>, vector<8x512xf32>,
    return
  }
  func.func @transform_0(%arg0: i32) -> (i32, i32) {
    %c0_i32 = arith.constant 0 : i32
    %c0_i32_0 = arith.constant 0 : i32
    return %arg0, %c0_i32 : i32, i32
  }
  func.func @transform_1(%arg0: i32) -> (i32, i32) {
    %c0_i32 = arith.constant 0 : i32
    %c0_i32_0 = arith.constant 0 : i32
    return %arg0, %c0_i32 : i32, i32
  }
}

</mosaic_0001>

<bundles_post_ra>
// kernel: tpu_custom_call.1
= control target key start
LH: loop header
LB: loop body
LE: loop exit
PB: predicated region body
PF: predicated region fallthrough
CT: control target
= control target key end

     0   :  { %6 = vsyncpa [#allocation3], 0  ;;  %s558_s0 = inlined_call_operand.hbm [shape: f32[16,512], index: 0, kind: input, shape index: {}]   ;;  %s559_s1 = inlined_call_operand.hbm [shape: f32[16,512], index: 1, kind: output, shape index: {}]  }
   0x1   :  { %8 = vsyncpa [#allocation3 + $0x1], 0 }
   0x2   :  { %9 = vsyncpa [#allocation4], 0 }
   0x3   :  { %11 = vsyncpa [#allocation4 + $0x1], 0  ;;  %s427_s6 = smov 0   ;;  %s429_s7 = smov 0  }
   0x4   :  { %s431_s8 = smov 0   ;;  %s433_s9 = smov 0  }
   0x5 LB: > { %s448_s10 = sadd.s32 4294967295, %s415_s9   ;;  %s255_s11 = sadd.s32 4294967294, %s415_s9   ;;  %s415_s9 = sphi %s433_s9, %s569_s9   ;;  %s411_s8 = sphi %s431_s8, %s568_s8   ;;  %s407_s7 = sphi %s429_s7, %s567_s7   ;;  %s403_s6 = sphi %s427_s6, %s566_s6  }
   0x6   : > { %s452_s12 = sadd.s32 1, %s415_s9   ;;  %s24_s13 = sadd.s32 1, %s411_s8 }
   0x7   : > { %s21_s14 = ssub.s32 %s415_s9, %s452_s12  ;;  %p31_p0 = scmp.ne.s32.totalorder %s411_s8, %s407_s7 }
   0x8   : > { %p22_p1 = scmp.eq.s32.totalorder %s21_s14, 0  ;;  %p32_p2 = scmp.eq.s32.totalorder %s415_s9, 0 }
   0x9   : > { %p37_p3 = scmp.ne.s32.totalorder %s407_s7, %s403_s6  ;;  %p38_p4 = scmp.eq.s32.totalorder %s448_s10, 0 }
   0xa   : > { %s464_s15 = scalar_select %p22_p1, %s411_s8, %s24_s13  }
   0xb   : > { %p466_p5 = por %p32_p2, %p31_p0  ;;  %p470_p6 = por %p38_p4, %p37_p3 }
   0xc   : > { %p61_p7 = scmp.eq.s32.totalorder %s448_s10, 1  ;;  %p67_p8 = scmp.eq.s32.totalorder %s255_s11, 1 }
   0xd   : > { %p283_p10 = scmp.lt.s32.totalorder %s415_s9, 2  ;;  %s87_s20 = sand.u32 1, %s411_s8  }
   0xe   : > { %p477_p11 = por %p61_p7, %p31_p0  ;;  %p481_p12 = por %p67_p8, %p37_p3 }
   0xf   : > { %s269_s21 = sshll.u32 %s415_s9, 5  ;;  %s258_s22 = sshll.u32 %s87_s20, 5 }
  0x10   : > { %s96_s25 = scalar_lea.hbm %s558_s0, %s269_s21  ;;  %s91_s27 = scalar_lea.vmem [#allocation2], %s258_s22 }
  0x11   : > { %s98_s26 = sshll.u32 %s96_s25, 4  ;;  %s100_s28 = sshll.u32 %s91_s27, 4  ;;  %s99_s26 = int_to_ptr.hbm [resolvable:$true] %s98_s26  ;;  %s101_s28 = int_to_ptr.vmem [resolvable:$true] %s100_s28 }
  0x12   : > { %p492_p13 = pnand %p283_p10, %p466_p5  ;;  %p261_p0 = scmp.ge.s32.totalorder %s415_s9, 1 }
  0x13   : > { %p105_p1 = scmp.lt.s32.totalorder %s415_s9, 3  ;;  %s88_s30 = scalar_lea.sflag [#allocation3], %s87_s20 }
  0x14   : > { %s319_s2 = sshra.s32 %s99_s26, 4  ;;  %p323_p3 = pneg %p492_p13  ;;  %s320_s2 = int_to_ptr.hbm [resolvable:$true] %s319_s2 }
  0x15   : > { %s321_s3 = scalar_lea.hbm %s320_s2, 32  ;;  %s326_s11 = scalar_lea.hbm %s558_s0, 64 }
  0x16   : > { %p322_p2 = scmp.ne.s32.totalorder %s320_s2, %s321_s3  ;;  %p327_p5 = scmp.lt.s32.totalorder %s320_s2, %s558_s0 }
  0x17   : > { %p328_p8 = scmp.lt.s32.totalorder %s326_s11, %s321_s3 }
  0x18   : > { %p324_p4 = pnand %p323_p3, %p322_p2 }
  0x19   : > { %p329_p10 = por %p328_p8, %p327_p5 }
  0x1a   : > { %p325_p7 = pneg %p324_p4 }
  0x1c   : > { %p330_p9 = pnand %p329_p10, %p325_p7 }
  0x1e   : > { %333 = shalt.err (!%p330_p9)
}
  0x1f   : > { %278 = dma.hbm_to_vmem [thread:$0]  (!%p492_p13), %s99_s26, 512, %s101_s28, %s88_s30  }
  0x20   : > { %p106_p2 = pnand %p261_p0, %p105_p1 }
  0x21   : > { %s513_s16 = sand.u32 (!%p106_p2), 1, %s407_s7  }
  0x22   : > { %109 = sbr.rel (%p106_p2) target bundleno = 195 (0xc3), region = 24  ;;  %s262_s20 = sshll.u32 (!%p106_p2), %s513_s16, 5 }
  0x23   : > { %s112_s21 = scalar_lea.sflag (!%p106_p2), [#allocation3], %s513_s16  ;;  %s115_s22 = scalar_lea.vmem (!%p106_p2), [#allocation2], %s262_s20 }
  0x27   : > { %394 = dma.done.wait (%p470_p6), %s112_s21, 512  }
  0x28   : > { %396 = vsyncadd (%p470_p6), %s112_s21, 4294966784  ;;  %v135_v0 = vld [vmem:[%s115_s22] sm:$0xff]  ;;  %v136_v1 = vld [vmem:[%s115_s22 + $0x8] sm:$0xff]  ;;  %s270_s17 = sshll.u32 %s448_s10, 5  ;;  %s134_s26 = scalar_lea.vmem [#allocation5], %s262_s20 }
  0x29   : > { %v137_v2 = vld [vmem:[%s115_s22 + $0x10] sm:$0xff]  ;;  %v138_v3 = vld [vmem:[%s115_s22 + $0x18] sm:$0xff]  ;;  %v139_v4 = vmul.f32 %v135_v0, %v135_v0  ;;  %v140_v5 = vmul.f32 %v136_v1, %v136_v1  ;;  %s180_s25 = scalar_lea.hbm %s559_s1, %s270_s17  ;;  %s182_s27 = sshll.u32 %s134_s26, 4  ;;  %s183_s27 = int_to_ptr.vmem [resolvable:$true] %s182_s27 }
  0x2a   : > { %v141_v6 = vmul.f32 %v137_v2, %v137_v2  ;;  %v142_v7 = vmul.f32 %v138_v3, %v138_v3  ;;  %s184_s28 = sshll.u32 %s180_s25, 4  ;;  %s169_s10 = scalar_lea.sflag [#allocation4], %s513_s16  ;;  %s185_s28 = int_to_ptr.hbm [resolvable:$true] %s184_s28 }
  0x2b   : > { %v143_v8 = vadd.f32 %v140_v5, %v139_v4  ;;  %s363_s29 = sshra.s32 %s185_s28, 4  ;;  %s369_s4 = scalar_lea.hbm %s559_s1, 64  ;;  %s364_s29 = int_to_ptr.hbm [resolvable:$true] %s363_s29 }
  0x2c   : > { %s365_s30 = scalar_lea.hbm %s364_s29, 32  ;;  %p370_p0 = scmp.lt.s32.totalorder %s364_s29, %s559_s1 }
  0x2d   : > { %v144_v9 = vadd.f32 %v143_v8, %v141_v6  ;;  %p366_p6 = scmp.ne.s32.totalorder %s364_s29, %s365_s30  ;;  %p371_p1 = scmp.lt.s32.totalorder %s369_s4, %s365_s30 }
  0x2f   : > { %v145_v10 = vadd.f32 %v144_v9, %v142_v7  ;;  %p367_p9 = pnand %p366_p6, %p477_p11  ;;  %p372_p3 = por %p371_p1, %p370_p0 }
  0x31   : > { %146 = vadd.xlane.f32.xlu0 %v145_v10  ;;  %p368_p13 = pneg %p367_p9 }
  0x33   : > { %p373_p4 = pnand %p372_p3, %p368_p13 }
  0xa4   : > { %v147_v11 = vpop.xlane.xlu0 %146 }
  0xa5   : > { %v148_v12 = vmax.f32 %v147_v11, 1e-24 }
  0xa7   : > { %317 = vrsqrt.f32 %v148_v12  ;;  %vm155_vm1 = vweird.f32 %v148_v12 }
  0xad   : > { %v318_v13 = vpop.eup %317 }
  0xae   : > { %v150_v14 = vmul.f32 %v318_v13, %v148_v12  ;;  %vm156_vm0 = vweird.f32 %v318_v13 }
  0xaf   : > { %vm157_vm2 = vmor %vm155_vm1, %vm156_vm0 }
  0xb0   : > { %v151_v15 = vmul.f32 %v318_v13, %v150_v14 }
  0xb2   : > { %v152_v16 = vmul.f32 0.5, %v151_v15 }
  0xb4   : > { %v153_v17 = vsub.f32 1.5, %v152_v16 }
  0xb6   : > { %v154_v18 = vmul.f32 %v318_v13, %v153_v17 }
  0xb8   : > { %v158_v19 = vsel %vm157_vm2, %v318_v13, %v154_v18 }
  0xb9   : > { %v159_v20 = vmul.f32 0.044194173, %v158_v19 }
  0xbb   : > { %v160_v21 = vmul.f32 %v159_v20, %v135_v0  ;;  %v161_v22 = vmul.f32 %v159_v20, %v136_v1  ;;  %v162_v23 = vmul.f32 %v159_v20, %v137_v2  ;;  %v163_v24 = vmul.f32 %v159_v20, %v138_v3 }
  0xbd   : > { %164 = vst [vmem:[%s134_s26] sm:$0xff] %v160_v21 }
  0xbe   : > { %165 = vst [vmem:[%s134_s26 + $0x8] sm:$0xff] %v161_v22 }
  0xbf   : > { %166 = vst [vmem:[%s134_s26 + $0x10] sm:$0xff] %v162_v23 }
  0xc0   : > { %167 = vst [vmem:[%s134_s26 + $0x18] sm:$0xff] %v163_v24 }
  0xc1   : > { %376 = shalt.err (!%p373_p4)
}
  0xc2   : > { %273 = dma.vmem_to_hbm [thread:$0]  (%p477_p11), %s183_s27, 512, %s185_s28, %s169_s10  }
  0xc3 PF: > { %s196_s13 = sand.u32 1, %s403_s6   ;;  %p565_p7 = scmp.ge.s32.totalorder %s415_s9, 2 }
  0xc4   : > { %s197_s14 = scalar_lea.sflag [#allocation4], %s196_s13 }
  0xc5   : > { %p280_p5 = pnand %p565_p7, %p481_p12 }
  0xc7   : > { %p281_p8 = pneg %p280_p5 }
  0xc9   : > { %398 = dma.done.wait (%p281_p8), %s197_s14, 512  }
  0xca   : > { %400 = vsyncadd (%p281_p8), %s197_s14, 4294966784  ;;  %p14_p10 = scmp.ge.s32.totalorder %s452_s12, 4   ;;  %s566_s6 = smov %s407_s7 }
  0xcb   : > { %s567_s7 = smov %s411_s8  ;;  %s568_s8 = smov %s464_s15 }
  0xcc   : > { %s569_s9 = smov %s452_s12  ;;  %16 = sbr.rel (!%p14_p10) target bundleno = 5 (0x5), region = 69 }
  0xd1   :  { %203 = vsyncpa [#allocation3], 1 }
  0xd2   :  { %205 = vsyncpa [#allocation3 + $0x1], 1 }
  0xd3   :  { %206 = vsyncpa [#allocation4], 1 }
  0xd4   :  { %208 = vsyncpa [#allocation4 + $0x1], 1 }

</bundles_post_ra>
